<compile_context>
chip_gen: v7x
topology: tpu7x:2x2x1
jax: 0.10.0
libtpu: 0.0.40
codegen_flags: <defaults>
</compile_context>

<pallas_src>
import functools

import jax
import jax.numpy as jnp
from jax.experimental import pallas as pl
from jax.experimental.pallas import tpu as pltpu


def _round_up(x, m):
    return ((x + m - 1) // m) * m


def _pick_tile(dim_p, unit, cap):
    """Largest multiple-of-`unit` divisor of dim_p that is <= cap."""
    if dim_p <= cap:
        return dim_p
    t = cap - (cap % unit)
    while t >= unit:
        if dim_p % t == 0:
            return t
        t -= unit
    return unit


def _apply_activation(y, activation):
    if activation == "sigmoid":
        return jax.nn.sigmoid(y)   # exp on the EUP slot
    return jnp.maximum(y, 0.0)     # ReLU on the VPU


def _linear_act_kernel_fused(x_ref, w_ref, b_ref, o_ref, *, activation):
    # Single K step: x_ref (tm, Kp) bf16, w_ref (Kp, tn) bf16, b_ref (1, tn) f32.
    y = jnp.dot(x_ref[...], w_ref[...], preferred_element_type=jnp.float32)
    y = y + b_ref[...]                       # bias applied exactly once, in f32
    o_ref[...] = _apply_activation(y, activation).astype(o_ref.dtype)


def _linear_act_kernel_acc(x_ref, w_ref, b_ref, o_ref, acc_ref, *, activation):
    # K-tiled path: f32 VMEM accumulator persists across the K grid axis.
    k = pl.program_id(2)

    @pl.when(k == 0)
    def _():
        acc_ref[...] = jnp.zeros_like(acc_ref)

    acc_ref[...] += jnp.dot(x_ref[...], w_ref[...],
                            preferred_element_type=jnp.float32)

    @pl.when(k == pl.num_programs(2) - 1)
    def _():
        y = acc_ref[...] + b_ref[...]
        o_ref[...] = _apply_activation(y, activation).astype(o_ref.dtype)


# Pipelined-buffer footprint estimate (double-buffered inputs/outputs + acc).
def _vmem_bytes(tm, tn, tk, kp):
    b = 2 * (tm * tk * 2)        # x tiles, bf16
    b += 2 * (tk * tn * 2)       # W tiles, bf16
    b += 2 * (tn * 4)            # bias tiles, f32
    b += 2 * (tm * tn * 4)       # output tiles, f32
    if tk < kp:
        b += tm * tn * 4         # f32 accumulator scratch
    return b


_VMEM_BUDGET = 24 * 1024 * 1024          # conservative: fits v7x (64 MiB phys)
_VMEM_LIMIT_BYTES = 48 * 1024 * 1024


def linear_w_activation(x, weight, bias, activation="sigmoid",
                        tm_cap=512, tn_cap=512):
    """Pallas equivalent of LinearWActivation.forward.

    x:      (B, in_features)            float32
    weight: (out_features, in_features) (PyTorch nn.Linear convention)
    bias:   (out_features,)
    """
    B, K = x.shape
    N, K_w = weight.shape
    assert K == K_w, "weight in_features mismatch"

    # Minimal alignment padding only: M -> 8, N/K -> 128.
    Mp = _round_up(B, 8)
    Np = _round_up(N, 128)
    Kp = _round_up(K, 128)

    # Tiles are divisors of the padded dims -> no full-tile re-padding waste.
    tm = _pick_tile(Mp, 8, tm_cap)       # small batch => whole batch resident
    tn = _pick_tile(Np, 128, tn_cap)

    # Collapse K entirely when it fits; otherwise tile K.
    tk = Kp
    while _vmem_bytes(tm, tn, tk, Kp) > _VMEM_BUDGET and tk > 128:
        tk = _pick_tile(Kp, 128, tk - 128)
    while _vmem_bytes(tm, tn, tk, Kp) > _VMEM_BUDGET and tn > 128:
        tn = _pick_tile(Np, 128, tn - 128)
    while _vmem_bytes(tm, tn, tk, Kp) > _VMEM_BUDGET and tm > 8:
        tm = _pick_tile(Mp, 8, tm - 8)

    # v7x has 2 TensorCores: make sure the parallel axes expose >= 2 blocks
    # when the problem allows it.
    if (Mp // tm == 1) and (Np // tn == 1) and (Np // 128 >= 2):
        tn = _pick_tile(Np, 128, Np // 2)

    # Operand prep: bf16 MXU feed, minimal zero-padding, weight pre-transposed
    # to (K, N).  In a real model this is one-time parameter prep, not per call.
    xp = x if (Mp == B and Kp == K) else jnp.pad(x, ((0, Mp - B), (0, Kp - K)))
    xp = xp.astype(jnp.bfloat16)
    wt = weight.T                                         # (K, N)
    if Kp != K or Np != N:
        wt = jnp.pad(wt, ((0, Kp - K), (0, Np - N)))
    wt = wt.astype(jnp.bfloat16)
    bp = bias if Np == N else jnp.pad(bias, (0, Np - N))
    bp = bp.reshape(1, Np).astype(jnp.float32)

    m_blocks, n_blocks, k_blocks = Mp // tm, Np // tn, Kp // tk

    # Truthful re-streaming estimate: W is read m_blocks times, x n_blocks times.
    flops = 2 * Mp * Kp * Np
    bytes_accessed = (2 * Mp * Kp * n_blocks       # x (bf16), re-streamed per N block
                      + 2 * Kp * Np * m_blocks     # W (bf16), re-streamed per M block
                      + 4 * Np                      # bias
                      + 4 * Mp * Np)                # output
    transcendentals = Mp * Np if activation == "sigmoid" else 0
    cost = pl.CostEstimate(flops=flops, transcendentals=transcendentals,
                           bytes_accessed=bytes_accessed)

    if k_blocks == 1:
        kernel = functools.partial(_linear_act_kernel_fused,
                                   activation=activation)
        grid_spec = pltpu.PrefetchScalarGridSpec(
            num_scalar_prefetch=0,
            grid=(m_blocks, n_blocks),
            in_specs=[
                pl.BlockSpec((tm, Kp), lambda i, j: (i, 0)),   # x
                pl.BlockSpec((Kp, tn), lambda i, j: (0, j)),   # W.T (K, N)
                pl.BlockSpec((1, tn), lambda i, j: (0, j)),    # bias
            ],
            out_specs=pl.BlockSpec((tm, tn), lambda i, j: (i, j)),
        )
        dim_sem = ("parallel", "parallel")
    else:
        kernel = functools.partial(_linear_act_kernel_acc,
                                   activation=activation)
        grid_spec = pltpu.PrefetchScalarGridSpec(
            num_scalar_prefetch=0,
            grid=(m_blocks, n_blocks, k_blocks),
            in_specs=[
                pl.BlockSpec((tm, tk), lambda i, j, k: (i, k)),   # x
                pl.BlockSpec((tk, tn), lambda i, j, k: (k, j)),   # W.T (K, N)
                pl.BlockSpec((1, tn), lambda i, j, k: (0, j)),    # bias
            ],
            out_specs=pl.BlockSpec((tm, tn), lambda i, j, k: (i, j)),
            scratch_shapes=[pltpu.VMEM((tm, tn), jnp.float32)],
        )
        dim_sem = ("parallel", "parallel", "arbitrary")

    out = pl.pallas_call(
        kernel,
        out_shape=jax.ShapeDtypeStruct((Mp, Np), x.dtype),
        grid_spec=grid_spec,
        compiler_params=pltpu.CompilerParams(
            dimension_semantics=dim_sem,
            vmem_limit_bytes=_VMEM_LIMIT_BYTES,
        ),
        cost_estimate=cost,
    )(xp, wt, bp)

    return out[:B, :N]


def _reference(x, weight, bias, activation="sigmoid"):
    y = x @ weight.T + bias
    if activation == "sigmoid":
        return jax.nn.sigmoid(y)
    return jnp.maximum(y, 0.0)


if __name__ == "__main__":
    key = jax.random.PRNGKey(0)
    kx, kw, kb = jax.random.split(key, 3)

    batch = 8
    in_features = 32
    out_features = 16

    x = jax.random.normal(kx, (batch, in_features), dtype=jnp.float32)
    # Deterministic parameter init (mimics nn.Linear uniform bound 1/sqrt(fan_in)).
    bound = 1.0 / jnp.sqrt(jnp.float32(in_features))
    weight = jax.random.uniform(
        kw, (out_features, in_features), minval=-bound, maxval=bound,
        dtype=jnp.float32)
    bias = jax.random.uniform(
        kb, (out_features,), minval=-bound, maxval=bound, dtype=jnp.float32)

    # bf16 MXU operands with f32 accumulation -> relaxed tolerance vs f32 ref.
    tol = dict(atol=2e-2, rtol=2e-2)

    # Sigmoid path
    out_sig = linear_w_activation(x, weight, bias, activation="sigmoid")
    out_sig = jax.block_until_ready(out_sig)
    ref_sig = _reference(x, weight, bias, activation="sigmoid")
    assert out_sig.shape == (batch, out_features)
    assert jnp.allclose(out_sig, ref_sig, **tol)

    # ReLU path
    out_relu = linear_w_activation(x, weight, bias, activation="relu")
    out_relu = jax.block_until_ready(out_relu)
    ref_relu = _reference(x, weight, bias, activation="relu")
    assert out_relu.shape == (batch, out_features)
    assert jnp.allclose(out_relu, ref_relu, **tol)

    print("KERNEL_OK")
</pallas_src>

<mosaic_0001>
module attributes {stable_mosaic.version = 11 : i64} {
  func.func @_linear_act_kernel_fused(%arg0: i32, %arg1: i32, %arg2: memref<8x128xbf16, #tpu.memory_space<vmem>>, %arg3: memref<128x128xbf16, #tpu.memory_space<vmem>>, %arg4: memref<1x128xf32, #tpu.memory_space<vmem>>, %arg5: memref<8x128xf32, #tpu.memory_space<vmem>>) attributes {dimension_semantics = [#tpu.dimension_semantics<parallel>, #tpu.dimension_semantics<parallel>], iteration_bounds = array<i64: 1, 1>, scalar_prefetch = 0 : i64, scratch_operands = 0 : i64, tpu.core_type = #tpu.core_type<tc>, window_params = [{transform_indices = @transform_0, window_bounds = array<i64: 8, 128>}, {transform_indices = @transform_1, window_bounds = array<i64: 128, 128>}, {transform_indices = @transform_2, window_bounds = array<i64: 1, 128>}, {transform_indices = @transform_3, window_bounds = array<i64: 8, 128>}]} {
    %c0 = arith.constant 0 : index
    %c0_0 = arith.constant 0 : index
    %0 = vector.load %arg2[%c0, %c0_0] : memref<8x128xbf16, #tpu.memory_space<vmem>>, vector<8x128xbf16>
    %c0_1 = arith.constant 0 : index
    %c0_2 = arith.constant 0 : index
    %1 = vector.load %arg3[%c0_1, %c0_2] : memref<128x128xbf16, #tpu.memory_space<vmem>>, vector<128x128xbf16>
    %cst = arith.constant dense<0.000000e+00> : vector<8x128xf32>
    %2 = tpu.matmul %0, %1, %cst {dimension_numbers = #tpu.dot_dimension_numbers<[1], [0], [0], [1], [0, 0, 1, 1], [], []>} : vector<8x128xbf16>, vector<128x128xbf16>, vector<8x128xf32> -> vector<8x128xf32>
    %c0_3 = arith.constant 0 : index
    %c0_4 = arith.constant 0 : index
    %3 = vector.load %arg4[%c0_3, %c0_4] : memref<1x128xf32, #tpu.memory_space<vmem>>, vector<1x128xf32>
    %4 = vector.broadcast %3 : vector<1x128xf32> to vector<8x128xf32>
    %5 = arith.addf %2, %4 : vector<8x128xf32>
    %6 = arith.negf %5 : vector<8x128xf32>
    %7 = math.exp %6 : vector<8x128xf32>
    %cst_5 = arith.constant 1.000000e+00 : f32
    %8 = vector.broadcast %cst_5 : f32 to vector<8x128xf32>
    %9 = arith.addf %8, %7 : vector<8x128xf32>
    %10 = arith.divf %8, %9 : vector<8x128xf32>
    %c0_6 = arith.constant 0 : index
    %c0_7 = arith.constant 0 : index
    %11 = vector.load %arg5[%c0_6, %c0_7] : memref<8x128xf32, #tpu.memory_space<vmem>>, vector<8x128xf32>
    tpu.vector_store %arg5[%c0_6, %c0_7], %10 {strides = array<i32>} : memref<8x128xf32, #tpu.memory_space<vmem>>, vector<8x128xf32>,
    return
  }
  func.func @transform_0(%arg0: i32, %arg1: i32) -> (i32, i32) {
    %c0_i32 = arith.constant 0 : i32
    %c0_i32_0 = arith.constant 0 : i32
    return %arg0, %c0_i32 : i32, i32
  }
  func.func @transform_1(%arg0: i32, %arg1: i32) -> (i32, i32) {
    %c0_i32 = arith.constant 0 : i32
    %c0_i32_0 = arith.constant 0 : i32
    return %c0_i32, %arg1 : i32, i32
  }
  func.func @transform_2(%arg0: i32, %arg1: i32) -> (i32, i32) {
    %c0_i32 = arith.constant 0 : i32
    %c0_i32_0 = arith.constant 0 : i32
    return %c0_i32, %arg1 : i32, i32
  }
  func.func @transform_3(%arg0: i32, %arg1: i32) -> (i32, i32) {
    %c0_i32 = arith.constant 0 : i32
    return %arg0, %arg1 : i32, i32
  }
}

</mosaic_0001>

<bundles_post_ra>
// kernel: tpu_custom_call.1
= control target key start
LH: loop header
LB: loop body
LE: loop exit
PB: predicated region body
PF: predicated region fallthrough
CT: control target
= control target key end

     0   :  { %8 = vsyncpa [#allocation3], 0  ;;  %s380_s0 = inlined_call_operand.hbm [shape: bf16[8,128], index: 0, kind: input, shape index: {}]   ;;  %s381_s1 = inlined_call_operand.hbm [shape: bf16[128,128], index: 1, kind: input, shape index: {}]   ;;  %s382_s2 = inlined_call_operand.vmem [shape: f32[1,128], index: 2, kind: input, shape index: {}]   ;;  %s383_s3 = inlined_call_operand.hbm [shape: f32[8,128], index: 3, kind: output, shape index: {}]  }
   0x1   :  { %9 = vsyncpa [#allocation6], 0 }
   0x2   :  { %10 = vsyncpa [#allocation4], 0  ;;  %s307_s12 = smov [#allocation2]   ;;  %s308_s14 = smov [#allocation5]  }
   0x3   :  { %s17_s13 = sshll.u32 %s307_s12, 4  ;;  %s26_s15 = sshll.u32 %s308_s14, 4  ;;  %s18_s13 = int_to_ptr.vmem [resolvable:$true] %s17_s13  ;;  %s334_s15 = int_to_ptr.vmem [resolvable:$true] %s26_s15 }
   0x4   :  { %s235_s18 = scalar_lea.hbm %s380_s0, 64 }
   0x5   :  { %p236_p0 = scmp.ne.s32.totalorder %s380_s0, %s235_s18  ;;  %p239_p1 = scmp.lt.u32.totalorder %s235_s18, %s380_s0 }
   0x7   :  { %p241_p2 = pnand %p239_p1, %p236_p0 }
   0x9   :  { %244 = shalt.err (!%p241_p2)
}
   0xa   :  { %s245_s23 = scalar_lea.vmem %s18_s13, 64  ;;  %p250_p4 = scmp.lt.s32.totalorder %s18_s13, %s18_s13 }
   0xb   :  { %p246_p3 = scmp.ne.s32.totalorder %s18_s13, %s245_s23  ;;  %p251_p5 = scmp.lt.s32.totalorder %s245_s23, %s245_s23 }
   0xd   :  { %p252_p6 = por %p251_p5, %p250_p4 }
   0xf   :  { %p253_p7 = pnand %p252_p6, %p246_p3 }
  0x11   :  { %256 = shalt.err (!%p253_p7)
}
  0x12   :  { %20 = dma.hbm_to_vmem [thread:$0]  %s380_s0, 64, %s18_s13, [#allocation3]  }
  0x13   :  { %s257_s28 = scalar_lea.hbm %s381_s1, 1024 }
  0x14   :  { %p258_p8 = scmp.ne.s32.totalorder %s381_s1, %s257_s28  ;;  %p261_p9 = scmp.lt.u32.totalorder %s257_s28, %s381_s1 }
  0x16   :  { %p263_p10 = pnand %p261_p9, %p258_p8 }
  0x18   :  { %266 = shalt.err (!%p263_p10)
}
  0x19   :  { %s267_s6 = scalar_lea.vmem %s334_s15, 1024  ;;  %p272_p12 = scmp.lt.s32.totalorder %s334_s15, %s334_s15 }
  0x1a   :  { %p268_p11 = scmp.ne.s32.totalorder %s334_s15, %s267_s6  ;;  %p273_p13 = scmp.lt.s32.totalorder %s267_s6, %s267_s6 }
  0x1c   :  { %p274_p0 = por %p273_p13, %p272_p12 }
  0x1e   :  { %p275_p1 = pnand %p274_p0, %p268_p11 }
  0x20   :  { %278 = shalt.err (!%p275_p1)
}
  0x21   :  { %s309_s0 = smov 64   ;;  %s310_s7 = smov 4  }
  0x22   :  { %32 = dma.hbm_to_vmem [thread:$0]  %s381_s1, 1024, %s334_s15, [#allocation6], %s309_s0, %s309_s0, %s310_s7  }
  0x23   :  { %301 = dma.done.wait [#allocation3], 64  }
  0x24   :  { %302 = vsyncadd [#allocation3], 4294967232 }
  0x25   :  { %303 = dma.done.wait [#allocation6], 1024  }
  0x26   :  { %304 = vsyncadd [#allocation6], 4294966272  ;;  %v311_v0 = vmov 0.0   ;;  %vm312_vm0 = vmmov 0   ;;  %v223_v1 = vld [vmem:[#allocation5] sm:$0xff]   ;;  %v224_v2 = vld [vmem:[#allocation5 + $0x8] sm:$0xff]  }
  0x27   :  { %196 = vmatprep.subr.bf16.mxu0 %v311_v0  ;;  %212 = vmatprep.mubr.msk.bf16.mxu0 %vm312_vm0, %v311_v0  ;;  %v225_v3 = vld [vmem:[#allocation5 + $0x10] sm:$0xff]   ;;  %v226_v4 = vld [vmem:[#allocation5 + $0x18] sm:$0xff]   ;;  %v227_v5 = vld [vmem:[#allocation5 + $0x20] sm:$0xff]   ;;  %s313_s11 = smov [#allocation7]  }
  0x28   :  { %197 = vmatpush3.bf16.msra.mxu0 %v223_v1  ;;  %v228_v6 = vld [vmem:[#allocation5 + $0x28] sm:$0xff]   ;;  %v229_v7 = vld [vmem:[#allocation5 + $0x30] sm:$0xff]   ;;  %v230_v8 = vld [vmem:[#allocation5 + $0x38] sm:$0xff]   ;;  %s167_s12 = sshll.u32 %s313_s11, 4  ;;  %s168_s12 = int_to_ptr.vmem [resolvable:$true] %s167_s12 }
  0x29   :  { %198 = vmatprep.subr.bf16.mxu0 %v311_v0  ;;  %v42_v9 = vld [vmem:[#allocation2] sm:$0xf]  ;;  %s279_s13 = scalar_lea.vmem %s168_s12, 128  ;;  %p284_p3 = scmp.lt.s32.totalorder %s168_s12, %s168_s12 }
  0x2a   :  { %v177_v10 = vld [vmem:[%s382_s2] ss:$0 sm:$0xff]  ;;  %p280_p2 = scmp.ne.s32.totalorder %s168_s12, %s279_s13  ;;  %p285_p4 = scmp.lt.s32.totalorder %s279_s13, %s279_s13 }
  0x2c   :  { %199 = vmatpush3.bf16.msra.mxu0 %v224_v2  ;;  %p286_p5 = por %p285_p4, %p284_p3 }
  0x2d   :  { %200 = vmatprep.subr.bf16.mxu0 %v311_v0 }
  0x2e   :  { %p287_p6 = pnand %p286_p5, %p280_p2 }
  0x30   :  { %201 = vmatpush3.bf16.msra.mxu0 %v225_v3 }
  0x31   :  { %202 = vmatprep.subr.bf16.mxu0 %v311_v0 }
  0x34   :  { %203 = vmatpush3.bf16.msra.mxu0 %v226_v4 }
  0x35   :  { %204 = vmatprep.subr.bf16.mxu0 %v311_v0 }
  0x38   :  { %205 = vmatpush3.bf16.msra.mxu0 %v227_v5 }
  0x39   :  { %206 = vmatprep.subr.bf16.mxu0 %v311_v0 }
  0x3c   :  { %207 = vmatpush3.bf16.msra.mxu0 %v228_v6 }
  0x3d   :  { %208 = vmatprep.subr.bf16.mxu0 %v311_v0 }
  0x40   :  { %209 = vmatpush3.bf16.msra.mxu0 %v229_v7 }
  0x41   :  { %210 = vmatprep.subr.bf16.mxu0 %v311_v0 }
  0x44   :  { %211 = vmatpush3.bf16.msra.mxu0 %v230_v8 }
  0x47   :  { %213 = vmatmul.mubr.bf16.vlgmr.msra.gmra.mrb[0].mxu0 %v42_v9 }
 0x11a   :  { %v148_v11 = vpop.f32.mrb[0].mxu0 }
 0x11b   :  { %v149_v12 = vadd.f32 %v177_v10, %v148_v11  ;;  %v214_v13 = vpop.f32.mrb[1].mxu0 }
 0x11c   :  { %v151_v14 = vpop.f32.mrb[2].mxu0 }
 0x11d   :  { %v186_v15 = vmul.f32 -1.442695, %v149_v12  ;;  %v215_v16 = vpop.f32.mrb[3].mxu0 }
 0x11f   :  { %231 = vpow2.f32 %v186_v15 }
 0x129   :  { %v232_v17 = vpop.eup %231 }
 0x12a   :  { %v157_v18 = vadd.f32 1.0, %v232_v17 }
 0x12c   :  { %233 = vrcp.f32 %v157_v18 }
 0x136   :  { %v234_v19 = vpop.eup %233 }
 0x137   :  { %160 = vst [vmem:[#allocation7] sm:$0xff] %v234_v19 }
 0x138   :  { %290 = shalt.err (!%p287_p6)
}
 0x139   :  { %s291_s15 = scalar_lea.hbm %s383_s3, 128 }
 0x13a   :  { %p292_p7 = scmp.ne.s32.totalorder %s383_s3, %s291_s15  ;;  %p295_p8 = scmp.lt.u32.totalorder %s291_s15, %s383_s3 }
 0x13c   :  { %p297_p9 = pnand %p295_p8, %p292_p7 }
 0x13e   :  { %300 = shalt.err (!%p297_p9)
}
 0x13f   :  { %170 = dma.vmem_to_hbm [thread:$0]  %s168_s12, 128, %s383_s3, [#allocation4]  }
 0x140   :  { %305 = dma.done.wait [#allocation4], 128  }
 0x141   :  { %306 = vsyncadd [#allocation4], 4294967168 }
 0x142   :  { %174 = vsyncpa [#allocation3], 1 }
 0x143   :  { %175 = vsyncpa [#allocation6], 1 }
 0x144   :  { %176 = vsyncpa [#allocation4], 1 }

</bundles_post_ra>
